<compile_context>
chip_gen: v6e
topology: v6e:2x2x1
jax: 0.10.0
libtpu: 0.0.40
codegen_flags: <defaults>
</compile_context>

<pallas_src>
import jax
import jax.numpy as jnp
from jax.experimental import pallas as pl
from jax.experimental.pallas import tpu as pltpu


def ghost_kernel(xp_ref, w0_ref, b0_ref, w1_ref, b1_ref, o_ref):
    # Layer 0 on the MXU: (tb/PACK, PACK*F) @ (PACK*F, PACK*L0).  The block-diagonal
    # W0 keeps the PACK samples sharing a packed row independent of each other.
    h = jnp.dot(xp_ref[...], w0_ref[...], preferred_element_type=jnp.float32)
    h = jnp.maximum(h + b0_ref[...], 0.0)
    # Layer 1 also on the MXU via the block W1 -> packed (tb/PACK, PACK) output
    # directly.  No transpose / XLU reduction needed, MXU has huge slack anyway.
    # (precision=jax.lax.Precision.HIGHEST could be added to both dots if bit-faithful
    #  f32 parity with the PyTorch float path were required; memory-bound => free.)
    z = jnp.dot(h, w1_ref[...], preferred_element_type=jnp.float32) + b1_ref[0]
    o_ref[...] = jax.nn.sigmoid(z).astype(o_ref.dtype)


def _round_up(n, m):
    return -(-n // m) * m


def _choose_pack(num_features):
    """Pick PACK samples per 128-lane row with PACK * f_pad == 128 (f_pad >= F)."""
    for f_pad in (1, 2, 4, 8, 16, 32, 64, 128):
        if f_pad >= num_features:
            return 128 // f_pad, f_pad
    # F > 128: no packing, just pad the feature dim to a lane multiple.
    return 1, _round_up(num_features, 128)


def ghost_forward(x, w0, b0, w1, b1, *, tb_max=32768, split_threshold=4096,
                  vmem_limit_bytes=48 * 1024 * 1024):
    """GhostNetwork forward: sigmoid(relu(x @ W0 + b0) @ W1 + b1).

    x : [B, F]  float32
    w0: [F, L0] float32  (= PyTorch layer0.weight.T)
    b0: [1, L0] float32
    w1: [L0, 1] float32  (= PyTorch output.weight.T)
    b1: [1]     float32  (scalar, placed in SMEM)
    returns [B, 1] float32
    """
    B, F = x.shape
    L0 = w0.shape[1]
    pack, f_pad = _choose_pack(F)

    # ---- Batch-tile selection (tb = samples per grid step) -------------------
    # align keeps packed rows (tb/pack) sublane-aligned and the lane axis dense.
    align = max(128, 8 * pack)
    if B <= split_threshold:
        # Latency-bound regime: one tile, no point splitting across TCs.
        tb = _round_up(B, align)
    else:
        # At least 2 tiles (dual-TC sharding on v7x), each as large as tb_max /
        # the VMEM budget allows.  tb_max=32K keeps worst-case per-step VMEM
        # (~0.6 KB/sample incl. double-buffered in/out + f32 temps) under 48 MiB.
        tb = min(_round_up(tb_max, align), _round_up(-(-B // 2), align))
    num_tiles = pl.cdiv(B, tb)
    B_pad = num_tiles * tb

    # ---- Pack inputs / build block weights (once, outside the kernel) --------
    if B_pad != B or f_pad != F:
        x = jnp.pad(x, ((0, B_pad - B), (0, f_pad - F)))
    xp = x.reshape(B_pad // pack, pack * f_pad)            # (B/8, 128): dense rows

    w0p = jnp.pad(w0, ((0, f_pad - F), (0, 0)))             # (f_pad, L0)
    eye = jnp.eye(pack, dtype=w0.dtype)
    w0_block = jnp.kron(eye, w0p)                           # (pack*f_pad, pack*L0) block-diag
    b0_block = jnp.tile(b0.reshape(1, L0), (1, pack))       # (1, pack*L0)
    w1_block = jnp.kron(eye, w1)                            # (pack*L0, pack) block matrix
    b1 = b1.reshape((1,)).astype(jnp.float32)

    out_packed = pl.pallas_call(
        ghost_kernel,
        out_shape=jax.ShapeDtypeStruct((B_pad // pack, pack), jnp.float32),
        grid_spec=pltpu.PrefetchScalarGridSpec(
            num_scalar_prefetch=0,
            grid=(num_tiles,),
            in_specs=[
                pl.BlockSpec((tb // pack, pack * f_pad), lambda i: (i, 0)),   # packed x (streamed)
                pl.BlockSpec((pack * f_pad, pack * L0), lambda i: (0, 0)),    # W0 block-diag (resident)
                pl.BlockSpec((1, pack * L0), lambda i: (0, 0)),               # b0 (resident)
                pl.BlockSpec((pack * L0, pack), lambda i: (0, 0)),            # W1 block (resident)
                pl.BlockSpec(memory_space=pltpu.MemorySpace.SMEM),            # b1 scalar
            ],
            out_specs=pl.BlockSpec((tb // pack, pack), lambda i: (i, 0)),     # packed (tb,1) output
        ),
        compiler_params=pltpu.CompilerParams(
            dimension_semantics=("parallel",),
            vmem_limit_bytes=vmem_limit_bytes,
        ),
    )(xp, w0_block, b0_block, w1_block, b1)

    # Packed (B_pad/8, 8) row-major is exactly samples 0..B_pad-1 in order.
    return out_packed.reshape(B_pad, 1)[:B]


def init_params(key, num_features, l0=32):
    """Deterministic init mimicking nn.Linear's uniform(-1/sqrt(fan_in), 1/sqrt(fan_in))."""
    k0w, k0b, k1w, k1b = jax.random.split(key, 4)
    bound0 = 1.0 / jnp.sqrt(num_features)
    bound1 = 1.0 / jnp.sqrt(l0)
    w0 = jax.random.uniform(k0w, (num_features, l0), jnp.float32, -bound0, bound0)
    b0 = jax.random.uniform(k0b, (1, l0), jnp.float32, -bound0, bound0)
    w1 = jax.random.uniform(k1w, (l0, 1), jnp.float32, -bound1, bound1)
    b1 = jax.random.uniform(k1b, (1,), jnp.float32, -bound1, bound1)
    return w0, b0, w1, b1


if __name__ == "__main__":
    # NOTE: QuantStub/DeQuantStub are identities in the float (non-quantized) path.
    key = jax.random.PRNGKey(0)
    kx, kp = jax.random.split(key)

    batch = 256
    num_features = 16
    l0 = 32

    x = jax.random.normal(kx, (batch, num_features), jnp.float32)
    w0, b0, w1, b1 = init_params(kp, num_features, l0)

    # Pure-JAX reference of the same math.
    ref = jax.nn.sigmoid(jnp.maximum(x @ w0 + b0, 0.0) @ w1 + b1[0])

    # Default path: batch is tiny -> single latency-bound tile.
    out = jax.block_until_ready(ghost_forward(x, w0, b0, w1, b1))
    assert out.shape == (batch, 1)
    assert jnp.allclose(out, ref, atol=1e-5), "single-tile mismatch vs reference"

    # Also exercise the multi-tile (pipelined / dual-TC) path at demo scale:
    # force 2 grid steps of 128 samples each.
    out2 = jax.block_until_ready(
        ghost_forward(x, w0, b0, w1, b1, tb_max=128, split_threshold=0))
    assert out2.shape == (batch, 1)
    assert jnp.allclose(out2, ref, atol=1e-5), "multi-tile mismatch vs reference"

    print("KERNEL_OK")
</pallas_src>

<mosaic_0001>
module attributes {stable_mosaic.version = 11 : i64} {
  func.func @ghost_kernel(%arg0: i32, %arg1: memref<32x128xf32, #tpu.memory_space<vmem>>, %arg2: memref<128x256xf32, #tpu.memory_space<vmem>>, %arg3: memref<1x256xf32, #tpu.memory_space<vmem>>, %arg4: memref<256x8xf32, #tpu.memory_space<vmem>>, %arg5: memref<1xf32, #tpu.memory_space<smem>>, %arg6: memref<32x8xf32, #tpu.memory_space<vmem>>) attributes {dimension_semantics = [#tpu.dimension_semantics<parallel>], iteration_bounds = array<i64: 1>, scalar_prefetch = 0 : i64, scratch_operands = 0 : i64, tpu.core_type = #tpu.core_type<tc>, window_params = [{transform_indices = @transform_0, window_bounds = array<i64: 32, 128>}, {pipeline_mode = #tpu.pipeline_mode<synchronous>, transform_indices = @transform_1, window_bounds = array<i64: 128, 256>}, {pipeline_mode = #tpu.pipeline_mode<synchronous>, transform_indices = @transform_2, window_bounds = array<i64: 1, 256>}, {pipeline_mode = #tpu.pipeline_mode<synchronous>, transform_indices = @transform_3, window_bounds = array<i64: 256, 8>}, {transform_indices = @transform_4, window_bounds = array<i64: 1>}, {transform_indices = @transform_5, window_bounds = array<i64: 32, 8>}]} {
    %c0 = arith.constant 0 : index
    %c0_0 = arith.constant 0 : index
    %0 = vector.load %arg1[%c0, %c0_0] : memref<32x128xf32, #tpu.memory_space<vmem>>, vector<32x128xf32>
    %c0_1 = arith.constant 0 : index
    %c0_2 = arith.constant 0 : index
    %1 = vector.load %arg2[%c0_1, %c0_2] : memref<128x256xf32, #tpu.memory_space<vmem>>, vector<128x256xf32>
    %cst = arith.constant dense<0.000000e+00> : vector<32x256xf32>
    %2 = tpu.matmul %0, %1, %cst {dimension_numbers = #tpu.dot_dimension_numbers<[1], [0], [0], [1], [0, 0, 1, 1], [], []>} : vector<32x128xf32>, vector<128x256xf32>, vector<32x256xf32> -> vector<32x256xf32>
    %c0_3 = arith.constant 0 : index
    %c0_4 = arith.constant 0 : index
    %3 = vector.load %arg3[%c0_3, %c0_4] : memref<1x256xf32, #tpu.memory_space<vmem>>, vector<1x256xf32>
    %4 = vector.broadcast %3 : vector<1x256xf32> to vector<32x256xf32>
    %5 = arith.addf %2, %4 : vector<32x256xf32>
    %cst_5 = arith.constant 0.000000e+00 : f32
    %6 = vector.broadcast %cst_5 : f32 to vector<32x256xf32>
    %7 = arith.maximumf %5, %6 : vector<32x256xf32>
    %c0_6 = arith.constant 0 : index
    %c0_7 = arith.constant 0 : index
    %8 = vector.load %arg4[%c0_6, %c0_7] : memref<256x8xf32, #tpu.memory_space<vmem>>, vector<256x8xf32>
    %cst_8 = arith.constant dense<0.000000e+00> : vector<32x8xf32>
    %9 = tpu.matmul %7, %8, %cst_8 {dimension_numbers = #tpu.dot_dimension_numbers<[1], [0], [0], [1], [0, 0, 1, 1], [], []>} : vector<32x256xf32>, vector<256x8xf32>, vector<32x8xf32> -> vector<32x8xf32>
    %c0_9 = arith.constant 0 : index
    %10 = memref.load %arg5[%c0_9] : memref<1xf32, #tpu.memory_space<smem>>
    %11 = vector.broadcast %10 : f32 to vector<32x8xf32>
    %12 = arith.addf %9, %11 : vector<32x8xf32>
    %13 = arith.negf %12 : vector<32x8xf32>
    %14 = math.exp %13 : vector<32x8xf32>
    %cst_10 = arith.constant 1.000000e+00 : f32
    %15 = vector.broadcast %cst_10 : f32 to vector<32x8xf32>
    %16 = arith.addf %15, %14 : vector<32x8xf32>
    %17 = arith.divf %15, %16 : vector<32x8xf32>
    %c0_11 = arith.constant 0 : index
    %c0_12 = arith.constant 0 : index
    %18 = vector.load %arg6[%c0_11, %c0_12] : memref<32x8xf32, #tpu.memory_space<vmem>>, vector<32x8xf32>
    tpu.vector_store %arg6[%c0_11, %c0_12], %17 {strides = array<i32>} : memref<32x8xf32, #tpu.memory_space<vmem>>, vector<32x8xf32>,
    return
  }
  func.func @transform_0(%arg0: i32) -> (i32, i32) {
    %c0_i32 = arith.constant 0 : i32
    %c0_i32_0 = arith.constant 0 : i32
    return %arg0, %c0_i32 : i32, i32
  }
  func.func @transform_1(%arg0: i32) -> (i32, i32) {
    %c0_i32 = arith.constant 0 : i32
    %c0_i32_0 = arith.constant 0 : i32
    %c0_i32_1 = arith.constant 0 : i32
    return %c0_i32, %c0_i32_0 : i32, i32
  }
  func.func @transform_2(%arg0: i32) -> (i32, i32) {
    %c0_i32 = arith.constant 0 : i32
    %c0_i32_0 = arith.constant 0 : i32
    %c0_i32_1 = arith.constant 0 : i32
    return %c0_i32, %c0_i32_0 : i32, i32
  }
  func.func @transform_3(%arg0: i32) -> (i32, i32) {
    %c0_i32 = arith.constant 0 : i32
    %c0_i32_0 = arith.constant 0 : i32
    %c0_i32_1 = arith.constant 0 : i32
    return %c0_i32, %c0_i32_0 : i32, i32
  }
  func.func @transform_4(%arg0: i32) -> i32 {
    %c0_i32 = arith.constant 0 : i32
    %c0_i32_0 = arith.constant 0 : i32
    return %c0_i32 : i32
  }
  func.func @transform_5(%arg0: i32) -> (i32, i32) {
    %c0_i32 = arith.constant 0 : i32
    %c0_i32_0 = arith.constant 0 : i32
    return %arg0, %c0_i32 : i32, i32
  }
}

</mosaic_0001>

<bundles_post_ra>
// kernel: tpu_custom_call.1
= control target key start
LH: loop header
LB: loop body
LE: loop exit
PB: predicated region body
PF: predicated region fallthrough
CT: control target
= control target key end

     0   :  { %11 = vsyncpa [#allocation4], 0  ;;  %s423_s18 = smov [#allocation3]   ;;  %s674_s0 = inlined_call_operand.hbm [shape: f32[32,128], index: 0, kind: input, shape index: {}]   ;;  %s675_s1 = inlined_call_operand.vmem [shape: f32[128,256], index: 1, kind: input, shape index: {}]   ;;  %s676_s2 = inlined_call_operand.vmem [shape: f32[1,256], index: 2, kind: input, shape index: {}]   ;;  %s677_s3 = inlined_call_operand.vmem [shape: f32[256,8], index: 3, kind: input, shape index: {}]   ;;  %s678_s4 = inlined_call_operand.<no memory space> [shape: f32[1], index: 4, kind: input, shape index: {}]   ;;  %s679_s5 = inlined_call_operand.vmem [shape: f32[32,8], index: 5, kind: output, shape index: {}]  }
   0x1   :  { %s17_s19 = sshll.u32 %s423_s18, 4  ;;  %s18_s19 = int_to_ptr.vmem [resolvable:$true] %s17_s19 }
   0x2   :  { %s409_s20 = scalar_lea.vmem %s18_s19, 512  ;;  %p414_p1 = scmp.lt.s32.totalorder %s18_s19, %s18_s19 }
   0x3   :  { %p410_p0 = scmp.ne.s32.totalorder %s18_s19, %s409_s20  ;;  %p415_p2 = scmp.lt.s32.totalorder %s409_s20, %s409_s20 }
   0x5   :  { %p416_p3 = por %p415_p2, %p414_p1 }
   0x7   :  { %p417_p4 = pnand %p416_p3, %p410_p0 }
   0x9   :  { %420 = shalt.err (!%p417_p4)
}
   0xa   :  { %s424_s21 = smov 128   ;;  %s425_s22 = smov 8  }
   0xb   :  { %23 = dma.hbm_to_vmem [thread:$0]  %s674_s0, 512, %s18_s19, [#allocation4], %s424_s21, %s424_s21, %s425_s22  }
   0xc   :  { %421 = dma.done.wait [#allocation4], 512  }
   0xd   :  { %422 = vsyncadd [#allocation4], 4294966784  ;;  %v426_v0 = vmov 0.0   ;;  %v70_v1 = vld [vmem:[%s675_s1 + $0xf8] sm:$0xff]  ;;  %v69_v2 = vld [vmem:[%s675_s1 + $0xf0] sm:$0xff]  ;;  %vm323_vm0 = vcmask 64512  }
   0xe   :  { %147 = vmatprep.mubr.f32.mxu0 %v426_v0  ;;  %v68_v3 = vld [vmem:[%s675_s1 + $0xe8] sm:$0xff]  ;;  %83 = vmatprep.subr.mxu0 %v70_v1  ;;  %v67_v4 = vld [vmem:[%s675_s1 + $0xe0] sm:$0xff]  ;;  %v66_v5 = vld [vmem:[%s675_s1 + $0xd8] sm:$0xff] }
   0xf   :  { %84 = vmatpush1.msra.mxu0 %v69_v2  ;;  %v65_v6 = vld [vmem:[%s675_s1 + $0xd0] sm:$0xff]  ;;  %v64_v7 = vld [vmem:[%s675_s1 + $0xc8] sm:$0xff]  ;;  %v63_v8 = vld [vmem:[%s675_s1 + $0xc0] sm:$0xff] }
  0x10   :  { %85 = vmatprep.subr.mxu0 %v68_v3  ;;  %v62_v9 = vld [vmem:[%s675_s1 + $0xb8] sm:$0xff]  ;;  %v61_v10 = vld [vmem:[%s675_s1 + $0xb0] sm:$0xff]  ;;  %v60_v11 = vld [vmem:[%s675_s1 + $0xa8] sm:$0xff] }
  0x11   :  { %86 = vmatpush1.msra.mxu0 %v67_v4  ;;  %v59_v12 = vld [vmem:[%s675_s1 + $0xa0] sm:$0xff]  ;;  %v58_v13 = vld [vmem:[%s675_s1 + $0x98] sm:$0xff]  ;;  %v57_v14 = vld [vmem:[%s675_s1 + $0x90] sm:$0xff] }
  0x12   :  { %87 = vmatprep.subr.mxu0 %v66_v5  ;;  %v56_v15 = vld [vmem:[%s675_s1 + $0x88] sm:$0xff]  ;;  %v211_v16 = vld [vmem:[%s677_s3 + $0xf8] sm:$0xff]  ;;  %v210_v18 = vld [vmem:[%s677_s3 + $0xf0] sm:$0xff]  ;;  %v73_v5 = vlaneseq }
  0x13   :  { %88 = vmatpush1.msra.mxu0 %v65_v6  ;;  %v195_v17 = vld [vmem:[%s677_s3 + $0x78] sm:$0xff]  ;;  %v55_v19 = vld [vmem:[%s675_s1 + $0x80] sm:$0xff]  ;;  %337 = vmatprep.subr.mxu1 %v211_v16  ;;  %v194_v20 = vld [vmem:[%s677_s3 + $0x70] sm:$0xff] }
  0x14   :  { %89 = vmatprep.subr.mxu0 %v64_v7  ;;  %v54_v21 = vld [vmem:[%s675_s1 + $0x78] sm:$0xff]  ;;  %338 = vmatpush3.msra.mxu1 %v195_v17  ;;  %v209_v22 = vld [vmem:[%s677_s3 + $0xe8] sm:$0xff]  ;;  %v53_v23 = vld [vmem:[%s675_s1 + $0x70] sm:$0xff]  ;;  %v74_v6 = vshrl.u32 %v73_v5, 7 }
  0x15   :  { %90 = vmatpush1.msra.mxu0 %v63_v8  ;;  %339 = vmatprep.subr.mxu1 %v210_v18  ;;  %v193_v24 = vld [vmem:[%s677_s3 + $0x68] sm:$0xff]  ;;  %v208_v26 = vld [vmem:[%s677_s3 + $0xe0] sm:$0xff]  ;;  %v50_v29 = vld [vmem:[%s675_s1 + $0x58] sm:$0xff] }
  0x16   :  { %91 = vmatprep.subr.mxu0 %v62_v9  ;;  %v52_v25 = vld [vmem:[%s675_s1 + $0x68] sm:$0xff]  ;;  %340 = vmatpush3.msra.mxu1 %v194_v20  ;;  %v51_v27 = vld [vmem:[%s675_s1 + $0x60] sm:$0xff]  ;;  %v207_v30 = vld [vmem:[%s677_s3 + $0xd8] sm:$0xff]  ;;  %v75_v7 = vsub.s32 0, %v74_v6  ;;  %v79_v9 = vsub.s32 1, %v74_v6 }
  0x17   :  { %92 = vmatpush1.msra.mxu0 %v61_v10  ;;  %341 = vmatprep.subr.mxu1 %v209_v22  ;;  %v192_v28 = vld [vmem:[%s677_s3 + $0x60] sm:$0xff]  ;;  %v49_v31 = vld [vmem:[%s675_s1 + $0x50] sm:$0xff]  ;;  %v191_v32 = vld [vmem:[%s677_s3 + $0x58] sm:$0xff] }
  0x18   :  { %93 = vmatprep.subr.mxu0 %v60_v11  ;;  %342 = vmatpush3.msra.mxu1 %v193_v24  ;;  %v48_v33 = vld [vmem:[%s675_s1 + $0x48] sm:$0xff]  ;;  %v206_v34 = vld [vmem:[%s677_s3 + $0xd0] sm:$0xff]  ;;  %v47_v35 = vld [vmem:[%s675_s1 + $0x40] sm:$0xff] }
  0x19   :  { %94 = vmatpush1.msra.mxu0 %v59_v12  ;;  %343 = vmatprep.subr.mxu1 %v208_v26  ;;  %v190_v36 = vld [vmem:[%s677_s3 + $0x50] sm:$0xff]  ;;  %v46_v37 = vld [vmem:[%s675_s1 + $0x38] sm:$0xff]  ;;  %v205_v38 = vld [vmem:[%s677_s3 + $0xc8] sm:$0xff] }
  0x1a   :  { %95 = vmatprep.subr.mxu0 %v58_v13  ;;  %344 = vmatpush3.msra.mxu1 %v192_v28  ;;  %v45_v39 = vld [vmem:[%s675_s1 + $0x30] sm:$0xff]  ;;  %v189_v40 = vld [vmem:[%s677_s3 + $0x48] sm:$0xff]  ;;  %v204_v42 = vld [vmem:[%s677_s3 + $0xc0] sm:$0xff] }
  0x1b   :  { %96 = vmatpush1.msra.mxu0 %v57_v14  ;;  %345 = vmatprep.subr.mxu1 %v207_v30  ;;  %v44_v41 = vld [vmem:[%s675_s1 + $0x28] sm:$0xff]  ;;  %v43_v43 = vld [vmem:[%s675_s1 + $0x20] sm:$0xff]  ;;  %v42_v45 = vld [vmem:[%s675_s1 + $0x18] sm:$0xff] }
  0x1c   :  { %97 = vmatprep.subr.mxu0 %v56_v15  ;;  %346 = vmatpush3.msra.mxu1 %v191_v32  ;;  %v188_v44 = vld [vmem:[%s677_s3 + $0x40] sm:$0xff]  ;;  %v203_v46 = vld [vmem:[%s677_s3 + $0xb8] sm:$0xff]  ;;  %v41_v47 = vld [vmem:[%s675_s1 + $0x10] sm:$0xff] }
  0x1d   :  { %98 = vmatpush1.msra.mxu0 %v55_v19  ;;  %347 = vmatprep.subr.mxu1 %v206_v34  ;;  %v187_v48 = vld [vmem:[%s677_s3 + $0x38] sm:$0xff]  ;;  %v40_v49 = vld [vmem:[%s675_s1 + $0x8] sm:$0xff]  ;;  %v202_v50 = vld [vmem:[%s677_s3 + $0xb0] sm:$0xff] }
  0x1e   :  { %99 = vmatprep.subr.mxu0 %v54_v21  ;;  %348 = vmatpush3.msra.mxu1 %v190_v36  ;;  %v39_v51 = vld [vmem:[%s675_s1] sm:$0xff]  ;;  %v186_v52 = vld [vmem:[%s677_s3 + $0x30] sm:$0xff]  ;;  %v201_v54 = vld [vmem:[%s677_s3 + $0xa8] sm:$0xff] }
  0x1f   :  { %100 = vmatpush1.msra.mxu0 %v53_v23  ;;  %349 = vmatprep.subr.mxu1 %v205_v38  ;;  %v35_v53 = vld [vmem:[#allocation3] sm:$0xff]  ;;  %v185_v55 = vld [vmem:[%s677_s3 + $0x28] sm:$0xff]  ;;  %v37_v59 = vld [vmem:[#allocation3 + $0x10] sm:$0xff] }
  0x20   :  { %101 = vmatprep.subr.mxu0 %v52_v25  ;;  %350 = vmatpush3.msra.mxu1 %v189_v40  ;;  %v200_v56 = vld [vmem:[%s677_s3 + $0xa0] sm:$0xff]  ;;  %v36_v58 = vld [vmem:[#allocation3 + $0x8] sm:$0xff]  ;;  %v38_v60 = vld [vmem:[#allocation3 + $0x18] sm:$0xff] }
  0x21   :  { %102 = vmatpush1.msra.mxu0 %v51_v27  ;;  %351 = vmatprep.subr.mxu1 %v204_v42  ;;  %v184_v57 = vld [vmem:[%s677_s3 + $0x20] sm:$0xff]  ;;  %v199_v61 = vld [vmem:[%s677_s3 + $0x98] sm:$0xff]  ;;  %v198_v63 = vld [vmem:[%s677_s3 + $0x90] sm:$0xff] }
  0x22   :  { %103 = vmatprep.subr.mxu0 %v50_v29  ;;  %352 = vmatpush3.msra.mxu1 %v188_v44  ;;  %v183_v62 = vld [vmem:[%s677_s3 + $0x18] sm:$0xff]  ;;  %v197_v1 = vld [vmem:[%s677_s3 + $0x88] sm:$0xff]  ;;  %v196_v3 = vld [vmem:[%s677_s3 + $0x80] sm:$0xff] }
  0x23   :  { %104 = vmatpush1.msra.mxu0 %v49_v31  ;;  %353 = vmatprep.subr.mxu1 %v203_v46  ;;  %v181_v2 = vld [vmem:[%s677_s3 + $0x8] sm:$0xff]  ;;  %v180_v4 = vld [vmem:[%s677_s3] sm:$0xff] }
  0x24   :  { %105 = vmatprep.subr.mxu0 %v48_v33  ;;  %354 = vmatpush3.msra.mxu1 %v187_v48  ;;  %v71_v8 = vld [vmem:[%s676_s2] sm:$0x3] }
  0x25   :  { %106 = vmatpush1.msra.mxu0 %v47_v35  ;;  %355 = vmatprep.subr.mxu1 %v202_v50  ;;  %v76_v10 = vrot.slane %v71_v8, %v75_v7  ;;  %v80_v11 = vrot.slane %v71_v8, %v79_v9 }
  0x26   :  { %107 = vmatprep.subr.mxu0 %v46_v37  ;;  %356 = vmatpush3.msra.mxu1 %v186_v52  ;;  %v213_v37 = vstv %s678_s4 }
  0x27   :  { %108 = vmatpush1.msra.mxu0 %v45_v39  ;;  %357 = vmatprep.subr.mxu1 %v201_v54 }
  0x28   :  { %109 = vmatprep.subr.mxu0 %v44_v41  ;;  %358 = vmatpush3.msra.mxu1 %v185_v55 }
  0x29   :  { %110 = vmatpush1.msra.mxu0 %v43_v43  ;;  %359 = vmatprep.subr.mxu1 %v200_v56 }
  0x2a   :  { %111 = vmatprep.subr.mxu0 %v42_v45  ;;  %360 = vmatpush3.msra.mxu1 %v184_v57 }
  0x2b   :  { %112 = vmatpush1.msra.mxu0 %v41_v47  ;;  %361 = vmatprep.subr.mxu1 %v199_v61 }
  0x2c   :  { %113 = vmatprep.subr.mxu0 %v40_v49  ;;  %362 = vmatpush3.msra.mxu1 %v183_v62 }
  0x2d   :  { %114 = vmatpush1.msra.mxu0 %v39_v51  ;;  %363 = vmatprep.subr.mxu1 %v198_v63 }
  0x2e   :  { %148 = vmatmul.mubr.f32.vlgmr.msra.gmra.mxu0 %v35_v53 }
  0x2f   :  { %153 = vmatprep.mubr.f32.mxu0 %v426_v0 }
  0x32   :  { %154 = vmatmul.mubr.f32.gmra.mxu0 %v36_v58 }
  0x33   :  { %159 = vmatprep.mubr.f32.mxu0 %v426_v0 }
  0x36   :  { %160 = vmatmul.mubr.f32.gmra.mxu0 %v37_v59 }
  0x37   :  { %165 = vmatprep.mubr.f32.mxu0 %v426_v0  ;;  %v182_v0 = vld [vmem:[%s677_s3 + $0x10] sm:$0xff] }
  0x38   :  { %364 = vmatpush3.msra.mxu1 %v182_v0 }
  0x39   :  { %365 = vmatprep.subr.mxu1 %v197_v1 }
  0x3a   :  { %166 = vmatmul.mubr.f32.gmra.mxu0 %v38_v60  ;;  %366 = vmatpush3.msra.mxu1 %v181_v2 }
  0x3b   :  { %367 = vmatprep.subr.mxu1 %v196_v3 }
  0x3c   :  { %368 = vmatpush3.msra.mxu1 %v180_v4 }
  0xee   :  { %v149_v12 = vpop.f32.mrf.mxu0 }
  0xef   :  { %v150_v13 = vadd.f32 %v149_v12, %v76_v10 }
  0xf0   :  { %v151_v14 = vpop.f32.mrf.mxu0 }
  0xf1   :  { %v152_v15 = vadd.f32 %v151_v14, %v80_v11  ;;  %v172_v18 = vmax.f32 %v150_v13, 0.0 }
  0xf2   :  { %v155_v16 = vpop.f32.mrf.mxu0 }
  0xf3   :  { %v173_v17 = vmax.f32 %v152_v15, 0.0  ;;  %v156_v19 = vadd.f32 %v155_v16, %v76_v10 }
  0xf4   :  { %v157_v20 = vpop.f32.mrf.mxu0 }
  0xf5   :  { %v158_v21 = vadd.f32 %v157_v20, %v80_v11  ;;  %278 = vmatprep.mubr.f32.mxu1 %v173_v17  ;;  %v174_v24 = vmax.f32 %v156_v19, 0.0 }
  0xf6   :  { %v161_v22 = vpop.f32.mrf.mxu0  ;;  %279 = vmatmul.mubr.f32.vlgmr.msra.gmra.mxu1 %v172_v18 }
  0xf7   :  { %v175_v23 = vmax.f32 %v158_v21, 0.0  ;;  %v162_v25 = vadd.f32 %v161_v22, %v76_v10 }
  0xf8   :  { %v163_v26 = vpop.f32.mrf.mxu0 }
  0xf9   :  { %v164_v27 = vadd.f32 %v163_v26, %v80_v11  ;;  %283 = vmatprep.mubr.f32.mxu1 %v175_v23  ;;  %v176_v30 = vmax.f32 %v162_v25, 0.0 }
  0xfa   :  { %v167_v28 = vpop.f32.mrf.mxu0  ;;  %284 = vmatmul.mubr.f32.gmra.mxu1 %v174_v24 }
  0xfb   :  { %v177_v29 = vmax.f32 %v164_v27, 0.0  ;;  %v168_v31 = vadd.f32 %v167_v28, %v76_v10 }
  0xfc   :  { %v169_v32 = vpop.f32.mrf.mxu0 }
  0xfd   :  { %v170_v33 = vadd.f32 %v169_v32, %v80_v11  ;;  %288 = vmatprep.mubr.f32.mxu1 %v177_v29  ;;  %v178_v35 = vmax.f32 %v168_v31, 0.0 }
  0xfe   :  { %289 = vmatmul.mubr.f32.gmra.mxu1 %v176_v30 }
  0xff   :  { %v179_v34 = vmax.f32 %v170_v33, 0.0 }
 0x101   :  { %293 = vmatprep.mubr.f32.mxu1 %v179_v34 }
 0x102   :  { %294 = vmatmul.mubr.f32.gmra.mxu1 %v178_v35 }
 0x1b6   :  { %v369_v36 = vpop.f32.mrf.mxu1 }
 0x1b8   :  { %v370_v38 = vpop.f32.mrf.mxu1 }
 0x1b9   :  { %v371_v39 = vadd.f32 %v370_v38, %v369_v36 }
 0x1ba   :  { %v372_v40 = vpop.f32.mrf.mxu1 }
 0x1bb   :  { %v281_v41 = vadd.f32 %v371_v39, %v213_v37 }
 0x1bc   :  { %v373_v42 = vpop.f32.mrf.mxu1 }
 0x1bd   :  { %v333_v43 = vmul.f32 -1.442695, %v281_v41  ;;  %v374_v44 = vadd.f32 %v373_v42, %v372_v40 }
 0x1be   :  { %v375_v45 = vpop.f32.mrf.mxu1 }
 0x1bf   :  { %385 = vpow2.f32 %v333_v43  ;;  %v286_v46 = vadd.f32 %v374_v44, %v213_v37 }
 0x1c0   :  { %v376_v47 = vpop.f32.mrf.mxu1 }
 0x1c1   :  { %v334_v48 = vmul.f32 -1.442695, %v286_v46  ;;  %v377_v49 = vadd.f32 %v376_v47, %v375_v45 }
 0x1c2   :  { %v378_v50 = vpop.f32.mrf.mxu1 }
 0x1c3   :  { %387 = vpow2.f32 %v334_v48  ;;  %v291_v51 = vadd.f32 %v377_v49, %v213_v37 }
 0x1c4   :  { %v379_v52 = vpop.f32.mrf.mxu1 }
 0x1c5   :  { %v335_v53 = vmul.f32 -1.442695, %v291_v51  ;;  %v380_v54 = vadd.f32 %v379_v52, %v378_v50 }
 0x1c7   :  { %389 = vpow2.f32 %v335_v53  ;;  %v296_v55 = vadd.f32 %v380_v54, %v213_v37 }
 0x1c9   :  { %v336_v56 = vmul.f32 -1.442695, %v296_v55 }
 0x1cb   :  { %391 = vpow2.f32 %v336_v56 }
 0x1cc   :  { %v386_v57 = vpop.eup %385 }
 0x1cd   :  { %v311_v58 = vadd.f32 1.0, %v386_v57 }
 0x1cf   :  { %393 = vrcp.f32 %v311_v58 }
 0x1d0   :  { %v388_v59 = vpop.eup %387 }
 0x1d1   :  { %v312_v60 = vadd.f32 1.0, %v388_v59 }
 0x1d3   :  { %395 = vrcp.f32 %v312_v60 }
 0x1d4   :  { %v390_v61 = vpop.eup %389 }
 0x1d5   :  { %v313_v62 = vadd.f32 1.0, %v390_v61 }
 0x1d7   :  { %397 = vrcp.f32 %v313_v62 }
 0x1d8   :  { %v392_v63 = vpop.eup %391 }
 0x1d9   :  { %v314_v0 = vadd.f32 1.0, %v392_v63 }
 0x1db   :  { %399 = vrcp.f32 %v314_v0 }
 0x1dc   :  { %v394_v1 = vpop.eup %393 }
 0x1dd   :  { %324 = vst.msk [vmem:[%s679_s5] sm:$0xff] %vm323_vm0, %v394_v1 }
 0x1e0   :  { %v396_v2 = vpop.eup %395 }
 0x1e1   :  { %325 = vst.msk [vmem:[%s679_s5 + $0x8] sm:$0xff] %vm323_vm0, %v396_v2 }
 0x1e4   :  { %v398_v3 = vpop.eup %397 }
 0x1e5   :  { %326 = vst.msk [vmem:[%s679_s5 + $0x10] sm:$0xff] %vm323_vm0, %v398_v3 }
 0x1e8   :  { %v400_v4 = vpop.eup %399 }
 0x1e9   :  { %327 = vst.msk [vmem:[%s679_s5 + $0x18] sm:$0xff] %vm323_vm0, %v400_v4 }
 0x1ea   :  { %332 = vsyncpa [#allocation4], 1 }

</bundles_post_ra>
